<compile_context>
chip_gen: v7x
topology: tpu7x:2x2x1
jax: 0.10.0
libtpu: 0.0.40
codegen_flags: <defaults>
</compile_context>

<pallas_src>
import jax
import jax.numpy as jnp
from jax.experimental import pallas as pl
from jax.experimental.pallas import tpu as pltpu


def _landmark_head_kernel(w_ref, b_ref, x_ref, o_ref):
    # w_ref: (Cout, Cin)  b_ref: (Cout, 1)  x_ref: (Cin, t_hw)  o_ref: (Cout, t_hw)
    acc = jnp.dot(w_ref[...], x_ref[...], preferred_element_type=jnp.float32)
    acc = acc + b_ref[...].astype(jnp.float32)
    o_ref[...] = acc.astype(o_ref.dtype)


def _round_up(a, m):
    return (a + m - 1) // m * m


def _vmem_budget():
    """(vmem_limit_bytes, per-block budget) derived from the actual chip."""
    try:
        cap = int(getattr(pltpu.get_tpu_info(), "vmem_capacity_bytes", 64 << 20))
    except Exception:
        cap = 64 << 20
    vmem_limit = min(cap // 2, 64 << 20)   # 32 MiB on v7x, 64 MiB on v5e/v6e
    block_budget = vmem_limit // 3         # headroom: weights/bias/compiler scratch
    return vmem_limit, block_budget


def _choose_t_hw(n, hw, cin, cout, itemsize, block_budget, min_steps=4):
    """Lane-dense HW tile: as big as the VMEM budget allows, but small enough
    that the (N, HW-tiles) grid has >= min_steps total steps (v7x megacore
    split + double-buffer pipelining)."""
    if hw < 128:
        return hw                                   # single full-extent tile
    # Columns whose double-buffered x(Cin) + out(Cout) blocks fit the budget.
    budget_cols = block_budget // (2 * itemsize * (cin + cout))
    cap = max(128, min(8192, (budget_cols // 128) * 128))
    hw_ceil = _round_up(hw, 128)
    want_hw_tiles = max(1, -(-min_steps // max(1, n)))        # ceil(min_steps/N)
    t_split = _round_up(-(-hw // want_hw_tiles), 128)         # ceil(HW/tiles), 128-aligned
    return max(128, min(cap, t_split, hw_ceil))


def landmark_head_forward(x_nchw, weight, bias, num_anchors=3):
    """x_nchw: (N, Cin, H, W); weight: (Cout, Cin, 1, 1); bias: (Cout,).
    Returns (N, H*W*num_anchors, 10), matching
    conv1x1(x).permute(0, 2, 3, 1).reshape(N, -1, 10)."""
    N, Cin, H, W = x_nchw.shape
    Cout = weight.shape[0]
    assert Cout == num_anchors * 10
    HW = H * W

    dtype = x_nchw.dtype
    x_flat = x_nchw.reshape(N, Cin, HW)        # free reshape: NCHW is contiguous
    w_mat = weight[:, :, 0, 0].astype(dtype)   # (Cout, Cin)
    b_col = bias.reshape(Cout, 1).astype(dtype)

    vmem_limit, block_budget = _vmem_budget()
    t_hw = _choose_t_hw(N, HW, Cin, Cout, jnp.dtype(dtype).itemsize, block_budget)

    grid = (N, pl.cdiv(HW, t_hw))              # ragged HW -> masked boundary block

    out = pl.pallas_call(
        _landmark_head_kernel,
        out_shape=jax.ShapeDtypeStruct((N, Cout, HW), dtype),
        grid_spec=pltpu.PrefetchScalarGridSpec(
            num_scalar_prefetch=0,
            grid=grid,
            in_specs=[
                pl.BlockSpec((Cout, Cin), lambda n, j: (0, 0)),        # weights (resident)
                pl.BlockSpec((Cout, 1), lambda n, j: (0, 0)),          # bias (resident)
                pl.BlockSpec((None, Cin, t_hw), lambda n, j: (n, 0, j)),   # x tile
            ],
            out_specs=pl.BlockSpec((None, Cout, t_hw), lambda n, j: (n, 0, j)),
        ),
        compiler_params=pltpu.CompilerParams(
            dimension_semantics=("parallel", "parallel"),
            vmem_limit_bytes=vmem_limit,
        ),
    )(w_mat, b_col, x_flat)

    # (N, Cout, HW) -> (N, HW, Cout) -> (N, HW*A, 10); matches
    # permute(0,2,3,1).view(N, -1, 10).  Touches only the small Cout-wide output.
    return jnp.transpose(out, (0, 2, 1)).reshape(N, HW * num_anchors, 10)


if __name__ == "__main__":
    # Small shapes consistent with the module (inchannels scaled down).
    # W=20 gives HW=320 (not a multiple of 128) to exercise the no-pad
    # boundary-block path.
    N, Cin, H, W = 2, 32, 16, 20
    num_anchors = 3
    Cout = num_anchors * 10

    key = jax.random.PRNGKey(0)
    kx, kw, kb = jax.random.split(key, 3)

    x = jax.random.normal(kx, (N, Cin, H, W), dtype=jnp.float32)
    weight = jax.random.normal(kw, (Cout, Cin, 1, 1), dtype=jnp.float32) * 0.05
    bias = jax.random.normal(kb, (Cout,), dtype=jnp.float32) * 0.05

    out = landmark_head_forward(x, weight, bias, num_anchors=num_anchors)
    out = jax.block_until_ready(out)

    # Reference in plain JAX (1x1 conv == channel matmul) with identical ordering.
    ref = (
        jnp.einsum("nchw,oc->nhwo", x, weight[:, :, 0, 0]) + bias
    ).reshape(N, H * W * num_anchors, 10)
    assert out.shape == (N, H * W * num_anchors, 10)
    assert jnp.allclose(out, ref, atol=1e-4, rtol=1e-4)

    print("KERNEL_OK")
</pallas_src>

<mosaic_0001>
module attributes {stable_mosaic.version = 11 : i64} {
  func.func @_landmark_head_kernel(%arg0: i32, %arg1: i32, %arg2: memref<30x32xf32, #tpu.memory_space<vmem>>, %arg3: memref<30x1xf32, #tpu.memory_space<vmem>>, %arg4: memref<1x32x256xf32, #tpu.memory_space<vmem>>, %arg5: memref<1x30x256xf32, #tpu.memory_space<vmem>>) attributes {dimension_semantics = [#tpu.dimension_semantics<parallel>, #tpu.dimension_semantics<parallel>], iteration_bounds = array<i64: 2, 2>, scalar_prefetch = 0 : i64, scratch_operands = 0 : i64, tpu.core_type = #tpu.core_type<tc>, window_params = [{pipeline_mode = #tpu.pipeline_mode<synchronous>, transform_indices = @transform_0, window_bounds = array<i64: 30, 32>}, {pipeline_mode = #tpu.pipeline_mode<synchronous>, transform_indices = @transform_1, window_bounds = array<i64: 30, 1>}, {transform_indices = @transform_2, window_bounds = array<i64: 1, 32, 256>}, {transform_indices = @transform_3, window_bounds = array<i64: 1, 30, 256>}]} {
    %c0 = arith.constant 0 : index
    %c0_0 = arith.constant 0 : index
    %0 = vector.load %arg2[%c0, %c0_0] : memref<30x32xf32, #tpu.memory_space<vmem>>, vector<30x32xf32>
    %c0_1 = arith.constant 0 : index
    %c0_2 = arith.constant 0 : index
    %c0_3 = arith.constant 0 : index
    %1 = vector.load %arg4[%c0_1, %c0_2, %c0_3] : memref<1x32x256xf32, #tpu.memory_space<vmem>>, vector<1x32x256xf32>
    %2 = vector.shape_cast %1 : vector<1x32x256xf32> to vector<32x256xf32>
    %cst = arith.constant dense<0.000000e+00> : vector<30x256xf32>
    %3 = tpu.matmul %0, %2, %cst {dimension_numbers = #tpu.dot_dimension_numbers<[1], [0], [0], [1], [0, 0, 1, 1], [], []>} : vector<30x32xf32>, vector<32x256xf32>, vector<30x256xf32> -> vector<30x256xf32>
    %c0_4 = arith.constant 0 : index
    %c0_5 = arith.constant 0 : index
    %4 = vector.load %arg3[%c0_4, %c0_5] : memref<30x1xf32, #tpu.memory_space<vmem>>, vector<30x1xf32>
    %5 = vector.broadcast %4 : vector<30x1xf32> to vector<30x256xf32>
    %6 = arith.addf %3, %5 : vector<30x256xf32>
    %c0_6 = arith.constant 0 : index
    %c0_7 = arith.constant 0 : index
    %c0_8 = arith.constant 0 : index
    %7 = vector.load %arg5[%c0_6, %c0_7, %c0_8] : memref<1x30x256xf32, #tpu.memory_space<vmem>>, vector<1x30x256xf32>
    %8 = vector.shape_cast %7 : vector<1x30x256xf32> to vector<30x256xf32>
    %9 = vector.shape_cast %6 : vector<30x256xf32> to vector<1x30x256xf32>
    tpu.vector_store %arg5[%c0_6, %c0_7, %c0_8], %9 {strides = array<i32>} : memref<1x30x256xf32, #tpu.memory_space<vmem>>, vector<1x30x256xf32>,
    return
  }
  func.func @transform_0(%arg0: i32, %arg1: i32) -> (i32, i32) {
    %c0_i32 = arith.constant 0 : i32
    %c0_i32_0 = arith.constant 0 : i32
    %c0_i32_1 = arith.constant 0 : i32
    return %c0_i32, %c0_i32_0 : i32, i32
  }
  func.func @transform_1(%arg0: i32, %arg1: i32) -> (i32, i32) {
    %c0_i32 = arith.constant 0 : i32
    %c0_i32_0 = arith.constant 0 : i32
    %c0_i32_1 = arith.constant 0 : i32
    return %c0_i32, %c0_i32_0 : i32, i32
  }
  func.func @transform_2(%arg0: i32, %arg1: i32) -> (i32, i32, i32) {
    %c0_i32 = arith.constant 0 : i32
    %c0_i32_0 = arith.constant 0 : i32
    return %arg0, %c0_i32, %arg1 : i32, i32, i32
  }
  func.func @transform_3(%arg0: i32, %arg1: i32) -> (i32, i32, i32) {
    %c0_i32 = arith.constant 0 : i32
    %c0_i32_0 = arith.constant 0 : i32
    return %arg0, %c0_i32, %arg1 : i32, i32, i32
  }
}

</mosaic_0001>

<bundles_post_ra>
// kernel: tpu_custom_call.1
= control target key start
LH: loop header
LB: loop body
LE: loop exit
PB: predicated region body
PF: predicated region fallthrough
CT: control target
= control target key end

     0   :  { %8 = vsyncpa [#allocation3], 0  ;;  %s1969_s0 = inlined_call_operand.vmem [shape: f32[30,32], index: 0, kind: input, shape index: {}]   ;;  %s1970_s1 = inlined_call_operand.vmem [shape: f32[30,1], index: 1, kind: input, shape index: {}]   ;;  %s1971_s2 = inlined_call_operand.hbm [shape: f32[2,32,320], index: 2, kind: input, shape index: {}]   ;;  %s1972_s3 = inlined_call_operand.vmem [shape: f32[2,30,320], index: 3, kind: output, shape index: {}]  }
   0x1   :  { %10 = vsyncpa [#allocation3 + $0x1], 0  ;;  %s1489_s12 = smov 0   ;;  %s1491_s13 = smov 0  }
   0x2   :  { %s1493_s14 = smov 0   ;;  %s1495_s15 = smov 0  }
   0x3   :  { %s1497_s16 = smov 0   ;;  %s1499_s17 = smov 0  }
   0x4   :  { %s1501_s18 = smov 0   ;;  %s1503_s19 = smov 0  }
   0x5 LB: > { %s25_s20 = sadd.s32 1, %s1388_s17  ;;  %s28_s21 = sadd.s32 1, %s1392_s18  ;;  %s1396_s19 = sphi %s1503_s19, %s16_s19   ;;  %s1392_s18 = sphi %s1501_s18, %s1993_s18   ;;  %s1388_s17 = sphi %s1499_s17, %s1992_s17   ;;  %s1384_s16 = sphi %s1497_s16, %s1991_s16   ;;  %s1380_s15 = sphi %s1495_s15, %s1990_s15   ;;  %s1376_s14 = sphi %s1493_s14, %s1989_s14   ;;  %s1372_s13 = sphi %s1491_s13, %s1988_s13   ;;  %s1368_s12 = sphi %s1489_s12, %s1987_s12  }
   0x6   : > { %p26_p0 = scmp.ge.s32.totalorder %s25_s20, 2  ;;  %s969_s22 = sadd.s32 4294967295, %s1396_s19  }
   0x7   : > { %p86_p1 = scmp.ne.s32.totalorder %s1376_s14, %s1372_s13  ;;  %p87_p2 = scmp.eq.s32.totalorder %s1396_s19, 0 }
   0x8   : > { %s1995_s20 = smov (%p26_p0, %s25_s20), 0  ;;  %s1997_s21 = smov (!%p26_p0, %s28_s21), %s1392_s18 }
   0x9   : > { %s75_s23 = ssub.s32 %s1388_s17, %s1995_s20  ;;  %p30_p3 = scmp.ge.s32.totalorder %s1997_s21, 2 }
   0xa   : > { %p92_p4 = scmp.ne.s32.totalorder %s1372_s13, %s1368_s12  ;;  %p88_p5 = por %p87_p2, %p86_p1 }
   0xb   : > { %p93_p6 = scmp.eq.s32.totalorder %s969_s22, 0  ;;  %s1999_s21 = smov (%p30_p3, %s1997_s21), 0 }
   0xc   : > { %p118_p8 = scmp.eq.s32.totalorder %s969_s22, 3  ;;  %s74_s25 = ssub.s32 %s1392_s18, %s1999_s21 }
   0xd   : > { %p1544_p7 = por %p93_p6, %p92_p4  ;;  %s79_s26 = sadd.s32 1, %s1376_s14 }
   0xe   : > { %s76_s27 = sor.u32 %s75_s23, %s74_s25  ;;  %p1554_p9 = por %p118_p8, %p86_p1 }
   0xf   : > { %p77_p10 = scmp.eq.s32.totalorder %s76_s27, 0  ;;  %p972_p11 = scmp.ge.s32.totalorder %s1396_s19, 4 }
  0x11   : > { %s1559_s29 = scalar_select %p77_p10, %s1376_s14, %s79_s26  }
  0x12   : > { %146 = sbr.rel (%p972_p11) target bundleno = 62 (0x3e), region = 24 }
  0x19   : > { %149 = sbr.rel (!%p88_p5) target bundleno = 62 (0x3e), region = 28  ;;  %s150_s30 = sand.u32 (%p88_p5), 1, %s1376_s14  }
  0x1a   : > { %s974_s4 = sshll.u32 (%p88_p5), %s1388_s17, 1  ;;  %s973_s5 = sshll.u32 (%p88_p5), %s150_s30, 6 }
  0x1b   : > { %s156_s6 = ssub.s32 (%p88_p5), 3, %s974_s4  ;;  %s1570_s9 = scalar_lea.sflag (%p88_p5), [#allocation3], %s150_s30 }
  0x1c   : > { %p157_p12 = scmp.lt.s32.totalorder (%p88_p5), %s156_s6, 2  ;;  %s154_s10 = scalar_lea.vmem (%p88_p5), [#allocation2], %s973_s5 }
  0x20   : > { %s2001_s6 = smov (!%p157_p12, %s156_s6), 2 }
  0x21   : > { %s1567_s7 = sshll.u32 %s2001_s6, 9 }
  0x22   : > { %s161_s8 = ssub.s32 1024, %s1567_s7 }
  0x23   : > { %162 = vsyncadd %s1570_s9, %s161_s8  ;;  %p976_p13 = scmp.ne.s32.totalorder %s1567_s7, 0  ;;  %s1035_s11 = smul.u32 12, %s1392_s18 }
  0x24   : > { %s978_s12 = sshll.u32 %s2001_s6, 3  ;;  %s170_s22 = sshll.u32 %s154_s10, 4  ;;  %s1576_s22 = int_to_ptr.vmem [resolvable:$true] %s170_s22 }
  0x25   : > { %s165_s23 = sadd.s32 %s1035_s11, %s974_s4  ;;  %s1242_s4 = scalar_lea.hbm %s1971_s2, 3072 }
  0x26   : > { %s977_s25 = sshll.u32 %s165_s23, 7 }
  0x27   : > { %s1581_s30 = scalar_lea.hbm %s1971_s2, %s977_s25 }
  0x28   : > { %s1238_s5 = scalar_lea.hbm %s1581_s30, %s1567_s7  ;;  %p1243_p3 = scmp.lt.u32.totalorder %s1581_s30, %s1971_s2 }
  0x29   : > { %p1239_p0 = scmp.ne.s32.totalorder %s1581_s30, %s1238_s5  ;;  %p1244_p4 = scmp.lt.u32.totalorder %s1242_s4, %s1238_s5 }
  0x2a   : > { %p1246_p6 = scmp.lt.u32.totalorder %s1238_s5, %s1581_s30 }
  0x2b   : > { %p1240_p1 = pnand %p1239_p0, %p976_p13  ;;  %p1245_p5 = por %p1244_p4, %p1243_p3 }
  0x2d   : > { %p1241_p2 = pneg %p1240_p1  ;;  %p1247_p8 = por %p1246_p6, %p1245_p5 }
  0x2f   : > { %p1248_p10 = pnand %p1247_p8, %p1241_p2 }
  0x31   : > { %1251 = shalt.err (!%p1248_p10)
}
  0x32   : > { %s1252_s25 = scalar_lea.vmem %s1576_s22, %s1567_s7  ;;  %s1462_s26 = smov [#allocation2]  }
  0x33   : > { %p1253_p11 = scmp.ne.s32.totalorder %s1576_s22, %s1252_s25  ;;  %s1256_s27 = sshll.u32 %s1462_s26, 4  ;;  %s1257_s27 = int_to_ptr.vmem [resolvable:$false] %s1256_s27 }
  0x34   : > { %s1258_s8 = scalar_lea.vmem %s1257_s27, 2048  ;;  %p1259_p1 = scmp.lt.s32.totalorder %s1576_s22, %s1257_s27 }
  0x35   : > { %p1254_p12 = pnand %p1253_p11, %p976_p13  ;;  %p1260_p3 = scmp.lt.s32.totalorder %s1258_s8, %s1252_s25 }
  0x37   : > { %p1255_p0 = pneg %p1254_p12  ;;  %p1261_p4 = por %p1260_p3, %p1259_p1 }
  0x39   : > { %p1262_p5 = pnand %p1261_p4, %p1255_p0 }
  0x3b   : > { %1265 = shalt.err (!%p1262_p5)
}
  0x3c   : > { %s1463_s5 = smov 384   ;;  %s1464_s10 = smov 256  }
  0x3d   : > { %176 = dma.hbm_to_vmem [thread:$0]  (%p976_p13), %s1581_s30, %s1567_s7, %s1576_s22, %s1570_s9, %s1463_s5, %s1464_s10, %s978_s12  }
  0x3e PF: > { %p981_p2 = scmp.ge.s32.totalorder %s1396_s19, 1  ;;  %p178_p6 = scmp.lt.s32.totalorder %s1396_s19, 5 }
  0x40   : > { %p179_p8 = pnand %p981_p2, %p178_p6 }
  0x41   : > { %s184_s4 = sand.u32 (!%p179_p8), 1, %s1372_s13  }
  0x42   : > { %182 = sbr.rel (%p179_p8) target bundleno = 434 (0x1b2), region = 32  ;;  %s1613_s11 = sshll.u32 (!%p179_p8), %s184_s4, 6 }
  0x43   : > { %s185_s23 = scalar_lea.sflag (!%p179_p8), [#allocation3], %s184_s4  ;;  %s188_s25 = scalar_lea.vmem (!%p179_p8), [#allocation2], %s1613_s11 }
  0x49   : > { %1363 = dma.done.wait (%p1544_p7), %s185_s23, 1024  }
  0x4a   : > { %1365 = vsyncadd (%p1544_p7), %s185_s23, 4294966272  ;;  %v1465_v0 = vmov 0.0   ;;  %v1466_v1 = vmov 0   ;;  %v225_v2 = vld [vmem:[%s188_s25 + $0x8] sm:$0xff]  ;;  %v227_v3 = vld [vmem:[%s188_s25 + $0x18] sm:$0xff]  ;;  %vm256_vm0 = vcmask 261120  }
  0x4b   : > { %333 = vmatprep.mubr.f32.mxu0 %v1465_v0  ;;  %345 = vmatprep.mubr.f32.mxu1 %v1465_v0  ;;  %v224_v4 = vld [vmem:[%s188_s25] sm:$0xff]  ;;  %v1023_v5 = vpack.c.bf16 %v227_v3, %v225_v2  ;;  %v226_v6 = vld [vmem:[%s188_s25 + $0x10] sm:$0xff]  ;;  %v229_v7 = vld [vmem:[%s188_s25 + $0x28] sm:$0xff]  ;;  %s1645_s6 = scalar_lea.vmem [#allocation4], %s1613_s11   ;;  %s989_s11 = sshll.u32 (%p1554_p9), %s1380_s15, 1 }
  0x4c   : > { %1237 = vset.pattern.permute.xlu1 %v1466_v1  ;;  %1236 = vset.pattern.permute.xlu0 %v1466_v1  ;;  %v231_v8 = vld [vmem:[%s188_s25 + $0x38] sm:$0xff]  ;;  %v1025_v9 = vpack.c.bf16 %v226_v6, %v224_v4  ;;  %v228_v11 = vld [vmem:[%s188_s25 + $0x20] sm:$0xff]  ;;  %v230_v12 = vld [vmem:[%s188_s25 + $0x30] sm:$0xff]  ;;  %s1036_s7 = smul.u32 (%p1554_p9), 12, %s1384_s16  ;;  %s374_s9 = ssub.s32 (%p1554_p9), 3, %s989_s11 }
  0x4d   : > { %v1027_v10 = vpack.c.bf16 %v231_v8, %v229_v7  ;;  %1024 = vmatprep.subr.bf16.mxu0 %v1023_v5  ;;  %1031 = vmatprep.subr.bf16.mxu1 %v1023_v5  ;;  %v1029_v13 = vpack.c.bf16 %v230_v12, %v228_v11  ;;  %v234_v14 = vld [vmem:[%s1970_s1 + $0x10] sm:$0xff]  ;;  %v232_v15 = vld [vmem:[%s1970_s1] sm:$0xff]  ;;  %v235_v16 = vld [vmem:[%s1970_s1 + $0x18] sm:$0x3f]  ;;  %p375_p7 = scmp.lt.s32.totalorder (%p1554_p9), %s374_s9, 2 }
  0x4e   : > { %1026 = vmatpush1.bf16.msra.mxu0 %v1025_v9  ;;  %1033 = vmatpush1.bf16.msra.mxu1 %v1025_v9  ;;  %v233_v17 = vld [vmem:[%s1970_s1 + $0x8] sm:$0xff]  ;;  %v220_v18 = vld [vmem:[%s1969_s0] sm:$0xff]  ;;  %v222_v19 = vld [vmem:[%s1969_s0 + $0x10] sm:$0xff]  ;;  %s380_s12 = sadd.s32 (%p1554_p9), %s1036_s7, %s989_s11 }
  0x4f   : > { %1028 = vmatprep.subr.bf16.mxu0 %v1027_v10  ;;  %1032 = vmatprep.subr.bf16.mxu1 %v1027_v10  ;;  %v221_v20 = vld [vmem:[%s1969_s0 + $0x8] sm:$0xff]  ;;  %v223_v21 = vld [vmem:[%s1969_s0 + $0x18] sm:$0x3f]  ;;  %s992_s22 = sshll.u32 (%p1554_p9), %s380_s12, 3 }
  0x50   : > { %248 = vperm.xlu1 %1237, %v234_v14   ;;  %238 = vperm.xlu0 %1236, %v232_v15   ;;  %s1662_s27 = scalar_lea.vmem (%p1554_p9), %s1972_s3, %s992_s22  }
  0x52   : > { %1030 = vmatpush1.bf16.msra.mxu0 %v1029_v13  ;;  %1034 = vmatpush1.bf16.msra.mxu1 %v1029_v13 }
  0x54   : > { %253 = vperm.xlu1 %1237, %v235_v16   ;;  %243 = vperm.xlu0 %1236, %v233_v17  }
  0x55   : > { %984 = vmatmul.mubr.msk.f32.vlgmr.msra.gmra.mrb[0].mxu0 %vm256_vm0, %v220_v18  ;;  %986 = vmatmul.mubr.msk.f32.vlgmr.msra.gmra.mrb[0].mxu1 %vm256_vm0, %v222_v19 }
  0x56   : > { %339 = vmatprep.mubr.f32.mxu0 %v1465_v0  ;;  %351 = vmatprep.mubr.f32.mxu1 %v1465_v0 }
  0x59   : > { %985 = vmatmul.mubr.msk.f32.gmra.mrb[2].mxu0 %vm256_vm0, %v221_v20  ;;  %987 = vmatmul.mubr.msk.f32.gmra.mrb[2].mxu1 %vm256_vm0, %v223_v21 }
  0xcf   : > { %v249_v22 = vpop.permute.xlu1 %248  ;;  %v239_v23 = vpop.permute.xlu0 %238 }
  0xd3   : > { %v254_v32 = vpop.permute.xlu1 %253  ;;  %v244_v33 = vpop.permute.xlu0 %243 }
 0x128   : > { %v335_v24 = vpop.f32.mrb[0].mxu0  ;;  %v347_v25 = vpop.f32.mrb[0].mxu1 }
 0x129   : > { %v336_v26 = vadd.f32 %v335_v24, %v239_v23  ;;  %v348_v27 = vadd.f32 %v347_v25, %v249_v22  ;;  %v337_v28 = vpop.f32.mrb[1].mxu0  ;;  %v349_v29 = vpop.f32.mrb[1].mxu1 }
 0x12a   : > { %v338_v30 = vadd.f32 %v337_v28, %v239_v23  ;;  %v350_v31 = vadd.f32 %v349_v29, %v249_v22  ;;  %372 = sbr.rel (!%p1554_p9) target bundleno = 434 (0x1b2), region = 40 }
 0x12b   : > { %358 = vst [vmem:[%s1645_s6] sm:$0xff] %v336_v26  ;;  %362 = vst [vmem:[%s1645_s6 + $0x20] sm:$0xff] %v348_v27 }
 0x12c   : > { %359 = vst [vmem:[%s1645_s6 + $0x8] sm:$0xff] %v338_v30  ;;  %363 = vst [vmem:[%s1645_s6 + $0x28] sm:$0xff] %v350_v31  ;;  %v341_v34 = vpop.f32.mrb[2].mxu0  ;;  %v353_v35 = vpop.f32.mrb[2].mxu1 }
 0x12d   : > { %v342_v36 = vadd.f32 %v341_v34, %v244_v33  ;;  %v354_v37 = vadd.f32 %v353_v35, %v254_v32  ;;  %v343_v38 = vpop.f32.mrb[3].mxu0  ;;  %v355_v39 = vpop.f32.mrb[3].mxu1 }
 0x12e   : > { %v344_v40 = vadd.f32 %v343_v38, %v244_v33  ;;  %v356_v41 = vadd.f32 %v355_v39, %v254_v32 }
 0x12f   : > { %360 = vst [vmem:[%s1645_s6 + $0x10] sm:$0xff] %v342_v36  ;;  %364 = vst [vmem:[%s1645_s6 + $0x30] sm:$0x3f] %v354_v37 }
 0x130   : > { %361 = vst [vmem:[%s1645_s6 + $0x18] sm:$0xff] %v344_v40  ;;  %365 = vst [vmem:[%s1645_s6 + $0x38] sm:$0x3f] %v356_v41 }
 0x131   : > { %s2003_s9 = smov (!%p375_p7, %s374_s9), 2 }
 0x132   : > { %s990_s8 = sshll.u32 %s2003_s9, 9  ;;  %s1664_s5 = sshll.u32 %s2003_s9, 3 }
 0x133   : > { %p994_p13 = scmp.eq.s32.totalorder %s990_s8, 0 }
 0x134   : > { %p387_p9 = scmp.lt.u32.totalorder (!%p994_p13), %s1664_s5, 8 }
 0x135   : > { %386 = sbr.rel (%p994_p13) target bundleno = 434 (0x1b2), region = 44 }
 0x13c   : > { %390 = sbr.rel (%p387_p9) target bundleno = 425 (0x1a9), region = 48  ;;  %s1668_s15 = sand.u32 (!%p387_p9), 7, %s1664_s5  }
 0x13d   : > { %p412_p10 = scmp.eq.s32.totalorder (!%p387_p9), %s1668_s15, 0  ;;  %p995_p11 = scmp.ne.s32.totalorder (!%p387_p9), %s1668_s15, 0 }
 0x143   : > { %415 = sbr.rel (%p995_p11) target bundleno = 371 (0x173), region = 63  ;;  %s416_s16 = sshrl.u32 (!%p995_p11), %s1664_s5, 3 }
 0x144   : > { %s1675_s28 = sshrl.u32 (!%p995_p11), %s416_s16, 4 }
 0x145   : > { %p996_p12 = scmp.le.s32.totalorder (!%p995_p11), %s1675_s28, 0 }
 0x14a   : > { %883 = sbr.rel (%p996_p12) target bundleno = 351 (0x15f), region = 150  ;;  %s1975_s10 = smov (!%p996_p12), %s1662_s27 }
 0x14b   : > { %s1976_s4 = smov (!%p996_p12), %s1645_s6  ;;  %s1684_s23 = smov (!%p996_p12), 0  }
 0x14c   : > { %s1686_s25 = smov (!%p996_p12), 0  }
 0x151 LB: >> { %v429_v42 = vld [vmem:[%s1404_s4] sm:$0xff]  ;;  %v431_v43 = vld [vmem:[%s1404_s4 + $0x8] sm:$0xff]  ;;  %v433_v44 = vld [vmem:[%s1404_s4 + $0x10] sm:$0xff]  ;;  %s557_s24 = sadd.s32 1, %s1408_s23  ;;  %s423_s25 = sadd.s32 1, %s1412_s25   ;;  %s1412_s25 = sphi %s1686_s25, %s423_s25   ;;  %s1408_s23 = sphi %s1684_s23, %s1977_s23   ;;  %s1404_s4 = sphi %s1976_s4, %s562_s4   ;;  %s1400_s10 = sphi %s1975_s10, %s563_s10  }
 0x152   : >> { %430 = vst [vmem:[%s1400_s10] sm:$0xff] %v429_v42  ;;  %432 = vst [vmem:[%s1400_s10 + $0x8] sm:$0xff] %v431_v43  ;;  %v463_v45 = vld [vmem:[%s1404_s4 + $0x18] sm:$0xff]  ;;  %v465_v46 = vld [vmem:[%s1404_s4 + $0x20] sm:$0xff]  ;;  %p558_p0 = scmp.ge.s32.totalorder %s557_s24, %s1675_s28  ;;  %p422_p1 = scmp.ge.s32.totalorder %s423_s25, %s1675_s28 }
 0x153   : >> { %434 = vst [vmem:[%s1400_s10 + $0x10] sm:$0xff] %v433_v44  ;;  %462 = vst [vmem:[%s1400_s10 + $0x18] sm:$0xff] %v433_v44  ;;  %v495_v47 = vld [vmem:[%s1404_s4 + $0x28] sm:$0xff]  ;;  %v497_v48 = vld [vmem:[%s1404_s4 + $0x30] sm:$0xff] }
 0x154   : >> { %464 = vst [vmem:[%s1400_s10 + $0x20] sm:$0xff] %v463_v45  ;;  %466 = vst [vmem:[%s1400_s10 + $0x28] sm:$0xff] %v465_v46  ;;  %v527_v49 = vld [vmem:[%s1404_s4 + $0x38] sm:$0xff]  ;;  %v529_v50 = vld [vmem:[%s1404_s4 + $0x40] sm:$0xff]  ;;  %s2005_s24 = smov (%p558_p0, %s557_s24), 0 }
 0x155   : >> { %494 = vst [vmem:[%s1400_s10 + $0x30] sm:$0xff] %v465_v46  ;;  %496 = vst [vmem:[%s1400_s10 + $0x38] sm:$0xff] %v495_v47  ;;  %v531_v51 = vld [vmem:[%s1404_s4 + $0x48] sm:$0xff]  ;;  %v533_v52 = vld [vmem:[%s1404_s4 + $0x50] sm:$0xff]  ;;  %s997_s11 = sshll.u32 %s2005_s24, 7  ;;  %s1977_s23 = smov %s2005_s24 }
 0x156   : >> { %498 = vst [vmem:[%s1400_s10 + $0x40] sm:$0xff] %v497_v48  ;;  %526 = vst [vmem:[%s1400_s10 + $0x48] sm:$0xff] %v497_v48  ;;  %v535_v53 = vld [vmem:[%s1404_s4 + $0x58] sm:$0xff]  ;;  %v537_v54 = vld [vmem:[%s1404_s4 + $0x60] sm:$0xff] }
 0x157   : >> { %528 = vst [vmem:[%s1400_s10 + $0x50] sm:$0xff] %v527_v49  ;;  %530 = vst [vmem:[%s1400_s10 + $0x58] sm:$0xff] %v529_v50  ;;  %v539_v55 = vld [vmem:[%s1404_s4 + $0x68] sm:$0xff]  ;;  %v541_v56 = vld [vmem:[%s1404_s4 + $0x70] sm:$0xff] }
 0x158   : >> { %532 = vst [vmem:[%s1400_s10 + $0x60] sm:$0xff] %v531_v51  ;;  %534 = vst [vmem:[%s1400_s10 + $0x68] sm:$0xff] %v533_v52  ;;  %v543_v57 = vld [vmem:[%s1404_s4 + $0x78] sm:$0xff]  ;;  %v545_v58 = vld [vmem:[%s1404_s4 + $0x80] sm:$0xff]  ;;  %425 = sbr.rel (!%p422_p1) target bundleno = 337 (0x151), region = 156 }
 0x159   : >> { %536 = vst [vmem:[%s1400_s10 + $0x70] sm:$0xff] %v535_v53  ;;  %538 = vst [vmem:[%s1400_s10 + $0x78] sm:$0xff] %v537_v54  ;;  %v547_v59 = vld [vmem:[%s1404_s4 + $0x88] sm:$0xff]  ;;  %v549_v60 = vld [vmem:[%s1404_s4 + $0x90] sm:$0xff] }
 0x15a   : >> { %540 = vst [vmem:[%s1400_s10 + $0x80] sm:$0xff] %v539_v55  ;;  %542 = vst [vmem:[%s1400_s10 + $0x88] sm:$0xff] %v541_v56  ;;  %v551_v61 = vld [vmem:[%s1404_s4 + $0x98] sm:$0xff]  ;;  %v553_v62 = vld [vmem:[%s1404_s4 + $0xa0] sm:$0xff] }
 0x15b   : >> { %544 = vst [vmem:[%s1400_s10 + $0x90] sm:$0xff] %v543_v57  ;;  %546 = vst [vmem:[%s1400_s10 + $0x98] sm:$0xff] %v545_v58  ;;  %v555_v63 = vld [vmem:[%s1404_s4 + $0xa8] sm:$0xff]  ;;  %s562_s4 = scalar_lea.vmem %s1645_s6, %s997_s11 [#allocation4]  }
 0x15c   : >> { %548 = vst [vmem:[%s1400_s10 + $0xa0] sm:$0xff] %v547_v59  ;;  %550 = vst [vmem:[%s1400_s10 + $0xa8] sm:$0xff] %v549_v60 }
 0x15d   : >> { %552 = vst [vmem:[%s1400_s10 + $0xb0] sm:$0xff] %v551_v61  ;;  %554 = vst [vmem:[%s1400_s10 + $0xb8] sm:$0xff] %v553_v62 }
 0x15e   : >> { %556 = vst [vmem:[%s1400_s10 + $0xc0] sm:$0xff] %v555_v63  ;;  %s563_s10 = scalar_lea.vmem %s1662_s27, %s997_s11  }
 0x15f PF: > { %s1763_s7 = sand.u32 15, %s416_s16   ;;  %s1019_s9 = sshll.u32 %s1675_s28, 11 }
 0x160   : > { %s568_s12 = sshra.s32 %s1019_s9, 4  ;;  %p1002_p3 = scmp.le.s32.totalorder %s1763_s7, 0 }
 0x161   : > { %s1767_s22 = scalar_lea.vmem %s1645_s6, %s568_s12 [#allocation4]   ;;  %s1770_s30 = scalar_lea.vmem %s1662_s27, %s568_s12  }
 0x162   : > { %897 = sbr.rel (%p1002_p3) target bundleno = 371 (0x173), region = 161  ;;  %s1978_s26 = smov (!%p1002_p3), %s1770_s30 }
 0x163   : > { %s1979_s8 = smov (!%p1002_p3), %s1767_s22  ;;  %s1779_s10 = smov (!%p1002_p3), 0  }
 0x164   : > { %s1426_s4 = smov (!%p1002_p3), 0  }
 0x169 LB: >> { %v584_v0 = vld [vmem:[%s1420_s8] sm:$0xff]  ;;  %v586_v1 = vld [vmem:[%s1420_s8 + $0x10] sm:$0xff]  ;;  %s592_s16 = sadd.s32 1, %s1424_s10  ;;  %s578_s4 = sadd.s32 1, %s1428_s4   ;;  %s1428_s4 = sphi %s1426_s4, %s578_s4   ;;  %s1424_s10 = sphi %s1779_s10, %s1980_s10   ;;  %s1420_s8 = sphi %s1979_s8, %s597_s8   ;;  %s1416_s26 = sphi %s1978_s26, %s598_s26  }
 0x16a   : >> { %v588_v2 = vld [vmem:[%s1420_s8 + $0x20] sm:$0xff]  ;;  %585 = vst [vmem:[%s1416_s26] sm:$0xff] %v584_v0  ;;  %587 = vst [vmem:[%s1416_s26 + $0x18] sm:$0xff] %v586_v1  ;;  %v590_v3 = vld [vmem:[%s1420_s8 + $0x30] sm:$0xff]  ;;  %p593_p4 = scmp.ge.s32.totalorder %s592_s16, %s1763_s7  ;;  %p577_p5 = scmp.ge.s32.totalorder %s578_s4, %s1763_s7 }
 0x16b   : >> { %589 = vst [vmem:[%s1416_s26 + $0x30] sm:$0xff] %v588_v2  ;;  %591 = vst [vmem:[%s1416_s26 + $0x48] sm:$0xff] %v590_v3 }
 0x16c   : >> { %s2007_s16 = smov (%p593_p4, %s592_s16), 0  ;;  %580 = sbr.rel (!%p577_p5) target bundleno = 361 (0x169), region = 167 }
 0x16d   : >> { %s1003_s28 = sshll.u32 %s2007_s16, 3  ;;  %s1980_s10 = smov %s2007_s16 }
 0x16e   : >> { %s597_s8 = scalar_lea.vmem %s1767_s22, %s1003_s28 [#allocation4]   ;;  %s598_s26 = scalar_lea.vmem %s1770_s30, %s1003_s28  }
 0x173 PF: > { %601 = sbr.rel (%p412_p10) target bundleno = 425 (0x1a9), region = 81  ;;  %s603_s23 = ssub.s32 (!%p412_p10), %s1664_s5, %s1668_s15 }
 0x174   : > { %s607_s25 = sshrl.u32 (!%p412_p10), %s1664_s5, 3  ;;  %s1800_s24 = scalar_lea.vmem (!%p412_p10), %s1645_s6, %s603_s23 [#allocation4] }
 0x175   : > { %s1803_s11 = scalar_lea.vmem (!%p412_p10), %s1662_s27, %s603_s23  ;;  %s1807_s9 = sshrl.u32 (!%p412_p10), %s607_s25, 4 }
 0x176   : > { %p1005_p2 = scmp.le.s32.totalorder (!%p412_p10), %s1807_s9, 0 }
 0x17a   : > { %911 = sbr.rel (%p1005_p2) target bundleno = 399 (0x18f), region = 172  ;;  %s1981_s7 = smov (!%p1005_p2), %s1662_s27 }
 0x17b   : > { %s1982_s12 = smov (!%p1005_p2), %s1645_s6  ;;  %s1816_s22 = smov (!%p1005_p2), 0  }
 0x17c   : > { %s1818_s30 = smov (!%p1005_p2), 0  }
 0x181 LB: >> { %v620_v4 = vld [vmem:[%s1436_s12] sm:$0xff]  ;;  %v622_v5 = vld [vmem:[%s1436_s12 + $0x8] sm:$0xff]  ;;  %v624_v6 = vld [vmem:[%s1436_s12 + $0x10] sm:$0xff]  ;;  %s748_s26 = sadd.s32 1, %s1440_s22  ;;  %s614_s30 = sadd.s32 1, %s1444_s30   ;;  %s1444_s30 = sphi %s1818_s30, %s614_s30   ;;  %s1440_s22 = sphi %s1816_s22, %s1983_s22   ;;  %s1436_s12 = sphi %s1982_s12, %s753_s12   ;;  %s1432_s7 = sphi %s1981_s7, %s754_s7  }
 0x182   : >> { %621 = vst [vmem:[%s1432_s7] sm:$0xff] %v620_v4  ;;  %623 = vst [vmem:[%s1432_s7 + $0x8] sm:$0xff] %v622_v5  ;;  %v654_v7 = vld [vmem:[%s1436_s12 + $0x18] sm:$0xff]  ;;  %v656_v8 = vld [vmem:[%s1436_s12 + $0x20] sm:$0xff]  ;;  %p749_p6 = scmp.ge.s32.totalorder %s748_s26, %s1807_s9  ;;  %p613_p8 = scmp.ge.s32.totalorder %s614_s30, %s1807_s9 }
 0x183   : >> { %625 = vst [vmem:[%s1432_s7 + $0x10] sm:$0xff] %v624_v6  ;;  %653 = vst [vmem:[%s1432_s7 + $0x18] sm:$0xff] %v624_v6  ;;  %v686_v9 = vld [vmem:[%s1436_s12 + $0x28] sm:$0xff]  ;;  %v688_v10 = vld [vmem:[%s1436_s12 + $0x30] sm:$0xff] }
 0x184   : >> { %655 = vst [vmem:[%s1432_s7 + $0x20] sm:$0xff] %v654_v7  ;;  %657 = vst [vmem:[%s1432_s7 + $0x28] sm:$0xff] %v656_v8  ;;  %v718_v11 = vld [vmem:[%s1436_s12 + $0x38] sm:$0xff]  ;;  %v720_v12 = vld [vmem:[%s1436_s12 + $0x40] sm:$0xff]  ;;  %s2009_s26 = smov (%p749_p6, %s748_s26), 0 }
 0x185   : >> { %685 = vst [vmem:[%s1432_s7 + $0x30] sm:$0xff] %v656_v8  ;;  %687 = vst [vmem:[%s1432_s7 + $0x38] sm:$0xff] %v686_v9  ;;  %v722_v13 = vld [vmem:[%s1436_s12 + $0x48] sm:$0xff]  ;;  %v724_v14 = vld [vmem:[%s1436_s12 + $0x50] sm:$0xff]  ;;  %s1006_s8 = sshll.u32 %s2009_s26, 7  ;;  %s1983_s22 = smov %s2009_s26 }
 0x186   : >> { %689 = vst [vmem:[%s1432_s7 + $0x40] sm:$0xff] %v688_v10  ;;  %717 = vst [vmem:[%s1432_s7 + $0x48] sm:$0xff] %v688_v10  ;;  %v726_v15 = vld [vmem:[%s1436_s12 + $0x58] sm:$0xff]  ;;  %v728_v16 = vld [vmem:[%s1436_s12 + $0x60] sm:$0xff] }
 0x187   : >> { %719 = vst [vmem:[%s1432_s7 + $0x50] sm:$0xff] %v718_v11  ;;  %721 = vst [vmem:[%s1432_s7 + $0x58] sm:$0xff] %v720_v12  ;;  %v730_v17 = vld [vmem:[%s1436_s12 + $0x68] sm:$0xff]  ;;  %v732_v18 = vld [vmem:[%s1436_s12 + $0x70] sm:$0xff] }
 0x188   : >> { %723 = vst [vmem:[%s1432_s7 + $0x60] sm:$0xff] %v722_v13  ;;  %725 = vst [vmem:[%s1432_s7 + $0x68] sm:$0xff] %v724_v14  ;;  %v734_v19 = vld [vmem:[%s1436_s12 + $0x78] sm:$0xff]  ;;  %v736_v20 = vld [vmem:[%s1436_s12 + $0x80] sm:$0xff]  ;;  %616 = sbr.rel (!%p613_p8) target bundleno = 385 (0x181), region = 178 }
 0x189   : >> { %727 = vst [vmem:[%s1432_s7 + $0x70] sm:$0xff] %v726_v15  ;;  %729 = vst [vmem:[%s1432_s7 + $0x78] sm:$0xff] %v728_v16  ;;  %v738_v21 = vld [vmem:[%s1436_s12 + $0x88] sm:$0xff]  ;;  %v740_v22 = vld [vmem:[%s1436_s12 + $0x90] sm:$0xff] }
 0x18a   : >> { %731 = vst [vmem:[%s1432_s7 + $0x80] sm:$0xff] %v730_v17  ;;  %733 = vst [vmem:[%s1432_s7 + $0x88] sm:$0xff] %v732_v18  ;;  %v742_v23 = vld [vmem:[%s1436_s12 + $0x98] sm:$0xff]  ;;  %v744_v24 = vld [vmem:[%s1436_s12 + $0xa0] sm:$0xff] }
 0x18b   : >> { %735 = vst [vmem:[%s1432_s7 + $0x90] sm:$0xff] %v734_v19  ;;  %737 = vst [vmem:[%s1432_s7 + $0x98] sm:$0xff] %v736_v20  ;;  %v746_v25 = vld [vmem:[%s1436_s12 + $0xa8] sm:$0xff]  ;;  %s753_s12 = scalar_lea.vmem %s1645_s6, %s1006_s8 [#allocation4]  }
 0x18c   : >> { %739 = vst [vmem:[%s1432_s7 + $0xa0] sm:$0xff] %v738_v21  ;;  %741 = vst [vmem:[%s1432_s7 + $0xa8] sm:$0xff] %v740_v22 }
 0x18d   : >> { %743 = vst [vmem:[%s1432_s7 + $0xb0] sm:$0xff] %v742_v23  ;;  %745 = vst [vmem:[%s1432_s7 + $0xb8] sm:$0xff] %v744_v24 }
 0x18e   : >> { %747 = vst [vmem:[%s1432_s7 + $0xc0] sm:$0xff] %v746_v25  ;;  %s754_s7 = scalar_lea.vmem %s1662_s27, %s1006_s8  }
 0x18f PF: > { %s1895_s10 = sand.u32 15, %s607_s25   ;;  %s1021_s4 = sshll.u32 %s1807_s9, 11 }
 0x190   : > { %s759_s16 = sshra.s32 %s1021_s4, 4  ;;  %p1011_p7 = scmp.le.s32.totalorder %s1895_s10, 0 }
 0x191   : > { %s1899_s28 = scalar_lea.vmem %s1645_s6, %s759_s16 [#allocation4]   ;;  %s1902_s23 = scalar_lea.vmem %s1662_s27, %s759_s16  }
 0x192   : > { %925 = sbr.rel (%p1011_p7) target bundleno = 419 (0x1a3), region = 183  ;;  %s1984_s7 = smov (!%p1011_p7), %s1902_s23 }
 0x193   : > { %s1985_s12 = smov (!%p1011_p7), %s1899_s28  ;;  %s1911_s22 = smov (!%p1011_p7), 0  }
 0x194   : > { %s1458_s30 = smov (!%p1011_p7), 0  }
 0x199 LB: >> { %v775_v26 = vld [vmem:[%s1452_s12] sm:$0xff]  ;;  %v777_v27 = vld [vmem:[%s1452_s12 + $0x10] sm:$0xff]  ;;  %s783_s25 = sadd.s32 1, %s1456_s22  ;;  %s769_s30 = sadd.s32 1, %s1460_s30   ;;  %s1460_s30 = sphi %s1458_s30, %s769_s30   ;;  %s1456_s22 = sphi %s1911_s22, %s1986_s22   ;;  %s1452_s12 = sphi %s1985_s12, %s788_s12   ;;  %s1448_s7 = sphi %s1984_s7, %s789_s7  }
 0x19a   : >> { %v779_v28 = vld [vmem:[%s1452_s12 + $0x20] sm:$0xff]  ;;  %776 = vst [vmem:[%s1448_s7] sm:$0xff] %v775_v26  ;;  %778 = vst [vmem:[%s1448_s7 + $0x18] sm:$0xff] %v777_v27  ;;  %v781_v29 = vld [vmem:[%s1452_s12 + $0x30] sm:$0xff]  ;;  %p784_p13 = scmp.ge.s32.totalorder %s783_s25, %s1895_s10  ;;  %p768_p9 = scmp.ge.s32.totalorder %s769_s30, %s1895_s10 }
 0x19b   : >> { %780 = vst [vmem:[%s1448_s7 + $0x30] sm:$0xff] %v779_v28  ;;  %782 = vst [vmem:[%s1448_s7 + $0x48] sm:$0xff] %v781_v29 }
 0x19c   : >> { %s2011_s25 = smov (%p784_p13, %s783_s25), 0  ;;  %771 = sbr.rel (!%p768_p9) target bundleno = 409 (0x199), region = 189 }
 0x19d   : >> { %s1012_s9 = sshll.u32 %s2011_s25, 3  ;;  %s1986_s22 = smov %s2011_s25 }
 0x19e   : >> { %s788_s12 = scalar_lea.vmem %s1899_s28, %s1012_s9 [#allocation4]   ;;  %s789_s7 = scalar_lea.vmem %s1902_s23, %s1012_s9  }
 0x1a3 PF: > { %s1467_s26 = smov 0  }
 0x1a4   : > { %s790_s8 = sshllo.u32 %s1467_s26, %s1668_s15 }
 0x1a5   : > { %v799_v30 = vld [vmem:[%s1800_s24] sm:%s790_s8]  ;;  %v801_v31 = vld [vmem:[%s1800_s24 + $0x10] sm:%s790_s8] }
 0x1a6   : > { %800 = vst [vmem:[%s1803_s11] sm:%s790_s8] %v799_v30  ;;  %802 = vst [vmem:[%s1803_s11 + $0x18] sm:%s790_s8] %v801_v31 }
 0x1a7   : > { %v803_v32 = vld [vmem:[%s1800_s24 + $0x20] sm:%s790_s8]  ;;  %v805_v33 = vld [vmem:[%s1800_s24 + $0x30] sm:%s790_s8] }
 0x1a8   : > { %804 = vst [vmem:[%s1803_s11 + $0x30] sm:%s790_s8] %v803_v32  ;;  %806 = vst [vmem:[%s1803_s11 + $0x48] sm:%s790_s8] %v805_v33 }
 0x1a9 PF: > { %p1014_p10 = scmp.ge.u32.totalorder %s1664_s5, 8 }
 0x1aa   : > { %s1468_s10 = smov (!%p1014_p10), 0  }
 0x1ab   : > { %393 = sbr.rel (%p1014_p10) target bundleno = 434 (0x1b2), region = 52  ;;  %s394_s15 = sshllo.u32 (!%p1014_p10), %s1468_s10, %s1664_s5 }
 0x1ac   : > { %v403_v34 = vld [vmem:[%s1645_s6] sm:%s394_s15] (!%p1014_p10)  ;;  %v405_v35 = vld [vmem:[%s1645_s6 + $0x10] sm:%s394_s15] (!%p1014_p10) }
 0x1ad   : > { %404 = vst [vmem:[%s1662_s27] sm:%s394_s15] (!%p1014_p10), %v403_v34  ;;  %406 = vst [vmem:[%s1662_s27 + $0x18] sm:%s394_s15] (!%p1014_p10), %v405_v35 }
 0x1ae   : > { %v407_v36 = vld [vmem:[%s1645_s6 + $0x20] sm:%s394_s15] (!%p1014_p10)  ;;  %v409_v37 = vld [vmem:[%s1645_s6 + $0x30] sm:%s394_s15] (!%p1014_p10) }
 0x1af   : > { %408 = vst [vmem:[%s1662_s27 + $0x30] sm:%s394_s15] (!%p1014_p10), %v407_v36  ;;  %410 = vst [vmem:[%s1662_s27 + $0x48] sm:%s394_s15] (!%p1014_p10), %v409_v37 }
 0x1b2 PF: > { %s16_s19 = sadd.s32 1, %s1396_s19   ;;  %s1987_s12 = smov %s1372_s13 }
 0x1b3   : > { %p13_p11 = scmp.ge.s32.totalorder %s16_s19, 6   ;;  %s1988_s13 = smov %s1376_s14 }
 0x1b4   : > { %s1989_s14 = smov %s1559_s29  ;;  %s1990_s15 = smov %s1388_s17 }
 0x1b5   : > { %s1991_s16 = smov %s1392_s18  ;;  %s1992_s17 = smov %s1995_s20 }
 0x1b6   : > { %s1993_s18 = smov %s1999_s21  ;;  %15 = sbr.rel (!%p13_p11) target bundleno = 5 (0x5), region = 200 }
 0x1bd   :  { %820 = vsyncpa [#allocation3], 1 }
 0x1be   :  { %822 = vsyncpa [#allocation3 + $0x1], 1 }

</bundles_post_ra>
